<compile_context>
chip_gen: v7x
topology: tpu7x:2x2x1
jax: 0.10.0
libtpu: 0.0.40
codegen_flags: <defaults>
</compile_context>

<pallas_src>
import functools

import jax
import jax.numpy as jnp
from jax import lax
from jax.experimental import pallas as pl
from jax.experimental.pallas import tpu as pltpu


def _block_kernel(x_ref, w1_ref, b1_ref, w2_ref, b2_ref, out_ref):
    # x_ref:   (H, W*Cin)         lane-dense un-padded input (also the residual)
    # w1_ref:  (3*W*Cin, W*Cmid)  banded conv1 weights, bn1 scale folded in
    # b1_ref:  (1, W*Cmid)        folded bn1 bias, tiled across W
    # w2_ref:  (3*W*Cmid, W*Cout) banded conv2 weights, bn2 scale folded in
    # b2_ref:  (1, W*Cout)        folded bn2 bias, tiled across W
    # out_ref: (H, W*Cout)        lane-dense output block
    x = x_ref[...]

    def band(rows):
        # (H, WC) -> (H, 3*WC): lanes = [row h-1 | row h | row h+1].  The zero
        # rows at the top/bottom edges implement the vertical padding=1; the
        # horizontal padding is already baked into the banded weight matrix.
        zero_row = jnp.zeros((1, rows.shape[1]), rows.dtype)
        up = jnp.concatenate([zero_row, rows[:-1, :]], axis=0)   # row h-1
        dn = jnp.concatenate([rows[1:, :], zero_row], axis=0)    # row h+1
        return jnp.concatenate([up, rows, dn], axis=1)

    # ---- conv1 (+ folded bn1 scale), bias, relu : one MXU matmul ----
    acc1 = jnp.dot(band(x), w1_ref[...], preferred_element_type=jnp.float32)
    mid = jnp.maximum(acc1 + b1_ref[...], 0.0).astype(x.dtype)

    # ---- conv2 (+ folded bn2 scale), bias, identity residual ----
    acc2 = jnp.dot(band(mid), w2_ref[...], preferred_element_type=jnp.float32)
    out = acc2 + b2_ref[...] + x.astype(jnp.float32)
    out_ref[...] = out.astype(out_ref.dtype)


def _fold_bn(gamma, beta, mean, var, eps=1e-5):
    gamma = gamma.astype(jnp.float32)
    mean = mean.astype(jnp.float32)
    scale = gamma / jnp.sqrt(var.astype(jnp.float32) + eps)
    bias = beta.astype(jnp.float32) - mean * scale
    return scale, bias


def _banded_conv_weights(w_oihw, scale, W):
    """PyTorch (Cout, Cin, 3, 3) conv weights -> (3*W*Cin, W*Cout) banded matrix
    implementing a 3x3 / stride-1 / pad-1 conv along the width dim, with the
    per-output-channel BN scale folded into the columns."""
    w_t = jnp.transpose(w_oihw, (2, 3, 1, 0)).astype(jnp.float32) * scale  # (3,3,Cin,Cout)
    ws = jnp.arange(W)[:, None]          # source column
    wo = jnp.arange(W)[None, :]          # output column
    dx = ws - wo + 1                     # tap index, valid when in [0, 3)
    valid = (dx >= 0) & (dx <= 2)
    g = w_t[:, jnp.clip(dx, 0, 2), :, :]                       # (3, Wsrc, Wout, Cin, Cout)
    g = jnp.where(valid[None, :, :, None, None], g, 0.0)
    g = jnp.transpose(g, (0, 1, 3, 2, 4))                      # (3, Wsrc, Cin, Wout, Cout)
    W_, Cin, Cout = g.shape[1], g.shape[2], g.shape[4]
    return g.reshape(3 * W_ * Cin, W_ * Cout)


@functools.partial(jax.jit, static_argnames=("compute_dtype",))
def basic_block_no_relu(x_nchw, w1, g1, be1, m1, v1, w2, g2, be2, m2, v2,
                        compute_dtype=jnp.float32):
    # x_nchw: (N, C, H, W) float32 (PyTorch layout at the boundary)
    N, Cin, H, W = x_nchw.shape
    Cmid = w1.shape[0]
    Cout = w2.shape[0]
    assert Cout == Cin, "identity residual (downsample=None) requires Cout == Cin"

    # NCHW -> lane-dense (N, H, W*Cin) (row-major NHWC flatten, free reshape).
    x_dense = (jnp.transpose(x_nchw, (0, 2, 3, 1))
               .reshape(N, H, W * Cin).astype(compute_dtype))

    s1, b1 = _fold_bn(g1, be1, m1, v1)
    s2, b2 = _fold_bn(g2, be2, m2, v2)

    w1_band = _banded_conv_weights(w1, s1, W).astype(compute_dtype)   # (3*W*Cin,  W*Cmid)
    w2_band = _banded_conv_weights(w2, s2, W).astype(compute_dtype)   # (3*W*Cmid, W*Cout)
    b1_dense = jnp.tile(b1.reshape(1, Cmid), (1, W))                  # (1, W*Cmid) f32
    b2_dense = jnp.tile(b2.reshape(1, Cout), (1, W))                  # (1, W*Cout) f32

    out_dense = pl.pallas_call(
        _block_kernel,
        out_shape=jax.ShapeDtypeStruct((N, H, W * Cout), jnp.float32),
        grid_spec=pltpu.PrefetchScalarGridSpec(
            num_scalar_prefetch=0,
            grid=(N,),
            in_specs=[
                pl.BlockSpec((None, H, W * Cin), lambda b: (b, 0, 0)),
                pl.BlockSpec((3 * W * Cin, W * Cmid), lambda b: (0, 0)),
                pl.BlockSpec((1, W * Cmid), lambda b: (0, 0)),
                pl.BlockSpec((3 * W * Cmid, W * Cout), lambda b: (0, 0)),
                pl.BlockSpec((1, W * Cout), lambda b: (0, 0)),
            ],
            out_specs=pl.BlockSpec((None, H, W * Cout), lambda b: (b, 0, 0)),
        ),
        compiler_params=pltpu.CompilerParams(
            dimension_semantics=("parallel",)),
    )(x_dense, w1_band, b1_dense, w2_band, b2_dense)

    # (N, H, W*Cout) -> NHWC (free reshape) -> NCHW for the caller.
    return jnp.transpose(out_dense.reshape(N, H, W, Cout), (0, 3, 1, 2))


def _reference(x_nchw, w1, g1, be1, m1, v1, w2, g2, be2, m2, v2, eps=1e-5):
    """Pure-JAX reference matching PyTorch (eval-mode BN, identity residual)."""
    dn = lax.conv_dimension_numbers(x_nchw.shape, w1.shape, ("NCHW", "OIHW", "NCHW"))

    def bn(y, g, b, m, v):
        g = g.reshape(1, -1, 1, 1); b = b.reshape(1, -1, 1, 1)
        m = m.reshape(1, -1, 1, 1); v = v.reshape(1, -1, 1, 1)
        return (y - m) / jnp.sqrt(v + eps) * g + b

    out = lax.conv_general_dilated(x_nchw, w1, (1, 1), [(1, 1), (1, 1)],
                                   dimension_numbers=dn)
    out = jnp.maximum(bn(out, g1, be1, m1, v1), 0.0)
    out = lax.conv_general_dilated(out, w2, (1, 1), [(1, 1), (1, 1)],
                                   dimension_numbers=dn)
    out = bn(out, g2, be2, m2, v2)
    return out + x_nchw


if __name__ == "__main__":
    key = jax.random.PRNGKey(0)
    N, C, H, W = 2, 8, 16, 16   # BasicBlock: Cin == Cmid == Cout, stride 1

    ks = jax.random.split(key, 12)
    x = jax.random.normal(ks[0], (N, C, H, W), jnp.float32)

    w1 = jax.random.normal(ks[1], (C, C, 3, 3), jnp.float32) * 0.1
    g1 = jax.random.uniform(ks[2], (C,), jnp.float32, 0.5, 1.5)
    be1 = jax.random.normal(ks[3], (C,), jnp.float32) * 0.1
    m1 = jax.random.normal(ks[4], (C,), jnp.float32) * 0.1
    v1 = jax.random.uniform(ks[5], (C,), jnp.float32, 0.5, 1.5)

    w2 = jax.random.normal(ks[6], (C, C, 3, 3), jnp.float32) * 0.1
    g2 = jax.random.uniform(ks[7], (C,), jnp.float32, 0.5, 1.5)
    be2 = jax.random.normal(ks[8], (C,), jnp.float32) * 0.1
    m2 = jax.random.normal(ks[9], (C,), jnp.float32) * 0.1
    v2 = jax.random.uniform(ks[10], (C,), jnp.float32, 0.5, 1.5)

    out = basic_block_no_relu(x, w1, g1, be1, m1, v1, w2, g2, be2, m2, v2)
    out = jax.block_until_ready(out)

    ref = _reference(x, w1, g1, be1, m1, v1, w2, g2, be2, m2, v2)
    assert out.shape == (N, C, H, W)
    err = float(jnp.max(jnp.abs(out - ref)))
    assert jnp.allclose(out, ref, atol=1e-4, rtol=1e-4), err

    print("KERNEL_OK")
</pallas_src>

<mosaic_0001>
module attributes {stable_mosaic.version = 11 : i64} {
  func.func @_block_kernel(%arg0: i32, %arg1: memref<1x16x128xf32, #tpu.memory_space<vmem>>, %arg2: memref<384x128xf32, #tpu.memory_space<vmem>>, %arg3: memref<1x128xf32, #tpu.memory_space<vmem>>, %arg4: memref<384x128xf32, #tpu.memory_space<vmem>>, %arg5: memref<1x128xf32, #tpu.memory_space<vmem>>, %arg6: memref<1x16x128xf32, #tpu.memory_space<vmem>>) attributes {dimension_semantics = [#tpu.dimension_semantics<parallel>], iteration_bounds = array<i64: 2>, scalar_prefetch = 0 : i64, scratch_operands = 0 : i64, tpu.core_type = #tpu.core_type<tc>, window_params = [{transform_indices = @transform_0, window_bounds = array<i64: 1, 16, 128>}, {pipeline_mode = #tpu.pipeline_mode<synchronous>, transform_indices = @transform_1, window_bounds = array<i64: 384, 128>}, {pipeline_mode = #tpu.pipeline_mode<synchronous>, transform_indices = @transform_2, window_bounds = array<i64: 1, 128>}, {pipeline_mode = #tpu.pipeline_mode<synchronous>, transform_indices = @transform_3, window_bounds = array<i64: 384, 128>}, {pipeline_mode = #tpu.pipeline_mode<synchronous>, transform_indices = @transform_4, window_bounds = array<i64: 1, 128>}, {transform_indices = @transform_5, window_bounds = array<i64: 1, 16, 128>}]} {
    %c0 = arith.constant 0 : index
    %c0_0 = arith.constant 0 : index
    %c0_1 = arith.constant 0 : index
    %0 = vector.load %arg1[%c0, %c0_0, %c0_1] : memref<1x16x128xf32, #tpu.memory_space<vmem>>, vector<1x16x128xf32>
    %1 = vector.shape_cast %0 : vector<1x16x128xf32> to vector<16x128xf32>
    %cst = arith.constant 0.000000e+00 : f32
    %2 = vector.broadcast %cst : f32 to vector<1x128xf32>
    %3 = vector.extract_strided_slice %1 {offsets = [0, 0], sizes = [15, 128], strides = [1, 1]} : vector<16x128xf32> to vector<15x128xf32>
    %4 = tpu.concatenate %2, %3 in 0 : vector<1x128xf32>, vector<15x128xf32> -> vector<16x128xf32>
    %5 = vector.extract_strided_slice %1 {offsets = [1, 0], sizes = [15, 128], strides = [1, 1]} : vector<16x128xf32> to vector<15x128xf32>
    %6 = tpu.concatenate %5, %2 in 0 : vector<15x128xf32>, vector<1x128xf32> -> vector<16x128xf32>
    %7 = tpu.concatenate %4, %1, %6 in 1 : vector<16x128xf32>, vector<16x128xf32>, vector<16x128xf32> -> vector<16x384xf32>
    %c0_2 = arith.constant 0 : index
    %c0_3 = arith.constant 0 : index
    %8 = vector.load %arg2[%c0_2, %c0_3] : memref<384x128xf32, #tpu.memory_space<vmem>>, vector<384x128xf32>
    %cst_4 = arith.constant dense<0.000000e+00> : vector<16x128xf32>
    %9 = tpu.matmul %7, %8, %cst_4 {dimension_numbers = #tpu.dot_dimension_numbers<[1], [0], [0], [1], [0, 0, 1, 1], [], []>} : vector<16x384xf32>, vector<384x128xf32>, vector<16x128xf32> -> vector<16x128xf32>
    %c0_5 = arith.constant 0 : index
    %c0_6 = arith.constant 0 : index
    %10 = vector.load %arg3[%c0_5, %c0_6] : memref<1x128xf32, #tpu.memory_space<vmem>>, vector<1x128xf32>
    %11 = vector.broadcast %10 : vector<1x128xf32> to vector<16x128xf32>
    %12 = arith.addf %9, %11 : vector<16x128xf32>
    %cst_7 = arith.constant 0.000000e+00 : f32
    %13 = vector.broadcast %cst_7 : f32 to vector<16x128xf32>
    %14 = arith.maximumf %12, %13 : vector<16x128xf32>
    %cst_8 = arith.constant 0.000000e+00 : f32
    %15 = vector.broadcast %cst_8 : f32 to vector<1x128xf32>
    %16 = vector.extract_strided_slice %14 {offsets = [0, 0], sizes = [15, 128], strides = [1, 1]} : vector<16x128xf32> to vector<15x128xf32>
    %17 = tpu.concatenate %15, %16 in 0 : vector<1x128xf32>, vector<15x128xf32> -> vector<16x128xf32>
    %18 = vector.extract_strided_slice %14 {offsets = [1, 0], sizes = [15, 128], strides = [1, 1]} : vector<16x128xf32> to vector<15x128xf32>
    %19 = tpu.concatenate %18, %15 in 0 : vector<15x128xf32>, vector<1x128xf32> -> vector<16x128xf32>
    %20 = tpu.concatenate %17, %14, %19 in 1 : vector<16x128xf32>, vector<16x128xf32>, vector<16x128xf32> -> vector<16x384xf32>
    %c0_9 = arith.constant 0 : index
    %c0_10 = arith.constant 0 : index
    %21 = vector.load %arg4[%c0_9, %c0_10] : memref<384x128xf32, #tpu.memory_space<vmem>>, vector<384x128xf32>
    %cst_11 = arith.constant dense<0.000000e+00> : vector<16x128xf32>
    %22 = tpu.matmul %20, %21, %cst_11 {dimension_numbers = #tpu.dot_dimension_numbers<[1], [0], [0], [1], [0, 0, 1, 1], [], []>} : vector<16x384xf32>, vector<384x128xf32>, vector<16x128xf32> -> vector<16x128xf32>
    %c0_12 = arith.constant 0 : index
    %c0_13 = arith.constant 0 : index
    %23 = vector.load %arg5[%c0_12, %c0_13] : memref<1x128xf32, #tpu.memory_space<vmem>>, vector<1x128xf32>
    %24 = vector.broadcast %23 : vector<1x128xf32> to vector<16x128xf32>
    %25 = arith.addf %22, %24 : vector<16x128xf32>
    %26 = arith.addf %25, %1 : vector<16x128xf32>
    %c0_14 = arith.constant 0 : index
    %c0_15 = arith.constant 0 : index
    %c0_16 = arith.constant 0 : index
    %27 = vector.load %arg6[%c0_14, %c0_15, %c0_16] : memref<1x16x128xf32, #tpu.memory_space<vmem>>, vector<1x16x128xf32>
    %28 = vector.shape_cast %27 : vector<1x16x128xf32> to vector<16x128xf32>
    %29 = vector.shape_cast %26 : vector<16x128xf32> to vector<1x16x128xf32>
    tpu.vector_store %arg6[%c0_14, %c0_15, %c0_16], %29 {strides = array<i32>} : memref<1x16x128xf32, #tpu.memory_space<vmem>>, vector<1x16x128xf32>,
    return
  }
  func.func @transform_0(%arg0: i32) -> (i32, i32, i32) {
    %c0_i32 = arith.constant 0 : i32
    %c0_i32_0 = arith.constant 0 : i32
    %c0_i32_1 = arith.constant 0 : i32
    return %arg0, %c0_i32, %c0_i32_0 : i32, i32, i32
  }
  func.func @transform_1(%arg0: i32) -> (i32, i32) {
    %c0_i32 = arith.constant 0 : i32
    %c0_i32_0 = arith.constant 0 : i32
    %c0_i32_1 = arith.constant 0 : i32
    return %c0_i32, %c0_i32_0 : i32, i32
  }
  func.func @transform_2(%arg0: i32) -> (i32, i32) {
    %c0_i32 = arith.constant 0 : i32
    %c0_i32_0 = arith.constant 0 : i32
    %c0_i32_1 = arith.constant 0 : i32
    return %c0_i32, %c0_i32_0 : i32, i32
  }
  func.func @transform_3(%arg0: i32) -> (i32, i32) {
    %c0_i32 = arith.constant 0 : i32
    %c0_i32_0 = arith.constant 0 : i32
    %c0_i32_1 = arith.constant 0 : i32
    return %c0_i32, %c0_i32_0 : i32, i32
  }
  func.func @transform_4(%arg0: i32) -> (i32, i32) {
    %c0_i32 = arith.constant 0 : i32
    %c0_i32_0 = arith.constant 0 : i32
    %c0_i32_1 = arith.constant 0 : i32
    return %c0_i32, %c0_i32_0 : i32, i32
  }
  func.func @transform_5(%arg0: i32) -> (i32, i32, i32) {
    %c0_i32 = arith.constant 0 : i32
    %c0_i32_0 = arith.constant 0 : i32
    %c0_i32_1 = arith.constant 0 : i32
    return %arg0, %c0_i32, %c0_i32_0 : i32, i32, i32
  }
}

</mosaic_0001>

<bundles_post_ra>
// kernel: basic_block_no_relu.1
= control target key start
LH: loop header
LB: loop body
LE: loop exit
PB: predicated region body
PF: predicated region fallthrough
CT: control target
= control target key end

     0   :  { %s1105_s18 = smov 0   ;;  %s1464_s0 = inlined_call_operand.vmem [shape: f32[2,16,128], index: 0, kind: input, shape index: {}]   ;;  %s1465_s1 = inlined_call_operand.vmem [shape: f32[384,128], index: 1, kind: input, shape index: {}]   ;;  %s1466_s2 = inlined_call_operand.vmem [shape: f32[1,128], index: 2, kind: input, shape index: {}]   ;;  %s1467_s3 = inlined_call_operand.vmem [shape: f32[384,128], index: 3, kind: input, shape index: {}]   ;;  %s1468_s4 = inlined_call_operand.vmem [shape: f32[1,128], index: 4, kind: input, shape index: {}]   ;;  %s1469_s5 = inlined_call_operand.vmem [shape: f32[2,16,128], index: 5, kind: output, shape index: {}]  }
   0x1 LB: > { %s728_s19 = sadd.s32 4294967295, %s1073_s18   ;;  %p732_p0 = scmp.ge.s32.totalorder %s1073_s18, 1  ;;  %s1073_s18 = sphi %s1105_s18, %s15_s18  }
   0x2   : > { %p187_p1 = scmp.lt.s32.totalorder %s1073_s18, 3 }
   0x4   : > { %p188_p2 = pnand %p732_p0, %p187_p1 }
   0x5   : > { %v259_v0 = vld [vmem:[%s1465_s1 + $0x80] sm:$0xff] (!%p188_p2)  ;;  %v260_v1 = vld [vmem:[%s1465_s1 + $0x88] sm:$0xff] (!%p188_p2)  ;;  %v261_v5 = vld [vmem:[%s1465_s1 + $0x90] sm:$0xff] (!%p188_p2)  ;;  %p1133_p3 = scmp.lt.s32.totalorder (!%p188_p2), %s728_s19, 1  ;;  %vm236_vm0 = vcmask (!%p188_p2), 1046528   ;;  %vm229_vm1 = vcmask (!%p188_p2), 1040384  }
   0x6   : > { %191 = sbr.rel (%p188_p2) target bundleno = 490 (0x1ea), region = 40  ;;  %v243_v2 = vld [vmem:[%s1465_s1] sm:$0xff] (!%p188_p2)  ;;  %v931_v3 = vpack.c.bf16 (!%p188_p2), %v260_v1, %v259_v0  ;;  %v244_v4 = vld [vmem:[%s1465_s1 + $0x8] sm:$0xff] (!%p188_p2)  ;;  %v262_v6 = vld [vmem:[%s1465_s1 + $0x98] sm:$0xff] (!%p188_p2) }
   0x7   : > { %v933_v7 = vpack.c.bf16 (!%p188_p2), %v244_v4, %v243_v2  ;;  %v935_v8 = vpack.c.bf16 (!%p188_p2), %v262_v6, %v261_v5  ;;  %v275_v9 = vld [vmem:[%s1465_s1 + $0x100] sm:$0xff] (!%p188_p2)  ;;  %v276_v10 = vld [vmem:[%s1465_s1 + $0x108] sm:$0xff] (!%p188_p2)  ;;  %v245_v11 = vld [vmem:[%s1465_s1 + $0x10] sm:$0xff] (!%p188_p2) }
   0x8   : > { %932 = vmatprep.subr.bf16.mxu0 (!%p188_p2), %v931_v3  ;;  %v963_v12 = vpack.c.bf16 (!%p188_p2), %v276_v10, %v275_v9  ;;  %v246_v13 = vld [vmem:[%s1465_s1 + $0x18] sm:$0xff] (!%p188_p2)  ;;  %v263_v14 = vld [vmem:[%s1465_s1 + $0xa0] sm:$0xff] (!%p188_p2)  ;;  %v264_v15 = vld [vmem:[%s1465_s1 + $0xa8] sm:$0xff] (!%p188_p2) }
   0x9   : > { %934 = vmatpush3.bf16.msra.mxu0 (!%p188_p2), %v933_v7  ;;  %v937_v16 = vpack.c.bf16 (!%p188_p2), %v246_v13, %v245_v11  ;;  %v277_v17 = vld [vmem:[%s1465_s1 + $0x110] sm:$0xff] (!%p188_p2)  ;;  %v278_v18 = vld [vmem:[%s1465_s1 + $0x118] sm:$0xff] (!%p188_p2)  ;;  %v939_v19 = vpack.c.bf16 (!%p188_p2), %v264_v15, %v263_v14  ;;  %v247_v21 = vld [vmem:[%s1465_s1 + $0x20] sm:$0xff] (!%p188_p2) }
   0xa   : > { %936 = vmatprep.subr.bf16.mxu0 (!%p188_p2), %v935_v8  ;;  %964 = vmatprep.subr.bf16.mxu1 (!%p188_p2), %v963_v12  ;;  %v967_v20 = vpack.c.bf16 (!%p188_p2), %v278_v18, %v277_v17  ;;  %v248_v22 = vld [vmem:[%s1465_s1 + $0x28] sm:$0xff] (!%p188_p2)  ;;  %v265_v23 = vld [vmem:[%s1465_s1 + $0xb0] sm:$0xff] (!%p188_p2)  ;;  %v266_v24 = vld [vmem:[%s1465_s1 + $0xb8] sm:$0xff] (!%p188_p2) }
   0xb   : > { %966 = vmatpush3.bf16.msra.mxu1 (!%p188_p2), %v963_v12  ;;  %v279_v25 = vld [vmem:[%s1465_s1 + $0x120] sm:$0xff] (!%p188_p2)  ;;  %v280_v26 = vld [vmem:[%s1465_s1 + $0x128] sm:$0xff] (!%p188_p2)  ;;  %v941_v28 = vpack.c.bf16 (!%p188_p2), %v248_v22, %v247_v21  ;;  %v281_v29 = vld [vmem:[%s1465_s1 + $0x130] sm:$0xff] (!%p188_p2)  ;;  %v943_v31 = vpack.c.bf16 (!%p188_p2), %v266_v24, %v265_v23 }
   0xc   : > { %968 = vmatprep.subr.bf16.mxu1 (!%p188_p2), %v967_v20  ;;  %v971_v27 = vpack.c.bf16 (!%p188_p2), %v280_v26, %v279_v25  ;;  %v282_v30 = vld [vmem:[%s1465_s1 + $0x138] sm:$0xff] (!%p188_p2)  ;;  %v249_v32 = vld [vmem:[%s1465_s1 + $0x30] sm:$0xff] (!%p188_p2)  ;;  %v267_v34 = vld [vmem:[%s1465_s1 + $0xc0] sm:$0xff] (!%p188_p2) }
   0xd   : > { %s1474_s19 = smov (!%p1133_p3, %s728_s19), 1  ;;  %938 = vmatpush3.bf16.msra.mxu0 %v937_v16  ;;  %v250_v33 = vld [vmem:[%s1465_s1 + $0x38] sm:$0xff]  ;;  %v268_v35 = vld [vmem:[%s1465_s1 + $0xc8] sm:$0xff]  ;;  %v975_v36 = vpack.c.bf16 %v282_v30, %v281_v29  ;;  %v283_v38 = vld [vmem:[%s1465_s1 + $0x140] sm:$0xff] }
   0xe   : > { %940 = vmatprep.subr.bf16.mxu0 %v939_v19  ;;  %s747_s23 = sshll.u32 %s1474_s19, 4  ;;  %v945_v37 = vpack.c.bf16 %v250_v33, %v249_v32  ;;  %v284_v39 = vld [vmem:[%s1465_s1 + $0x148] sm:$0xff]  ;;  %v947_v40 = vpack.c.bf16 %v268_v35, %v267_v34  ;;  %v251_v41 = vld [vmem:[%s1465_s1 + $0x40] sm:$0xff]  ;;  %v269_v43 = vld [vmem:[%s1465_s1 + $0xd0] sm:$0xff] }
   0xf   : > { %970 = vmatpush3.bf16.msra.mxu1 %v967_v20  ;;  %s219_s10 = scalar_lea.vmem %s1464_s0, %s747_s23  ;;  %v252_v42 = vld [vmem:[%s1465_s1 + $0x48] sm:$0xff]  ;;  %v270_v44 = vld [vmem:[%s1465_s1 + $0xd8] sm:$0xff]  ;;  %v979_v45 = vpack.c.bf16 %v284_v39, %v283_v38  ;;  %v285_v48 = vld [vmem:[%s1465_s1 + $0x150] sm:$0xff]  ;;  %s224_s22 = scalar_lea.vmem %s1469_s5, %s747_s23 }
  0x10   : > { %972 = vmatprep.subr.bf16.mxu1 %v971_v27  ;;  %v1227_v46 = vld [vmem:[%s219_s10] sm:$0xff]  ;;  %v949_v47 = vpack.c.bf16 %v252_v42, %v251_v41  ;;  %v286_v49 = vld [vmem:[%s1465_s1 + $0x158] sm:$0xff]  ;;  %v1236_v50 = vld [vmem:[%s219_s10 + $0x8] sm:$0xff]  ;;  %v951_v52 = vpack.c.bf16 %v270_v44, %v269_v43 }
  0x11   : > { %942 = vmatpush3.bf16.msra.mxu0 %v941_v28  ;;  %362 = vmatprep.mubr.f32.mxu0 %v1227_v46  ;;  %v237_v51 = vrot.slane %v1227_v46, 1  ;;  %v253_v53 = vld [vmem:[%s1465_s1 + $0x50] sm:$0xff]  ;;  %v254_v54 = vld [vmem:[%s1465_s1 + $0x58] sm:$0xff]  ;;  %v238_v55 = vrot.slane %v1236_v50, 1  ;;  %v271_v56 = vld [vmem:[%s1465_s1 + $0xe0] sm:$0xff]  ;;  %v983_v58 = vpack.c.bf16 %v286_v49, %v285_v48  ;;  %v230_v22 = vrot.slane %v1227_v46, 7 }
  0x12   : > { %944 = vmatprep.subr.bf16.mxu0 %v943_v31  ;;  %v272_v57 = vld [vmem:[%s1465_s1 + $0xe8] sm:$0xff]  ;;  %v953_v60 = vpack.c.bf16 %v254_v54, %v253_v53  ;;  %v287_v61 = vld [vmem:[%s1465_s1 + $0x160] sm:$0xff]  ;;  %v273_v2 = vld [vmem:[%s1465_s1 + $0xf0] sm:$0xff]  ;;  %v231_v25 = vrot.slane %v1236_v50, 7 }
  0x13   : > { %974 = vmatpush3.bf16.msra.mxu1 %v971_v27  ;;  %v239_v59 = vsel %vm236_vm0, %v237_v51, %v238_v55  ;;  %v288_v62 = vld [vmem:[%s1465_s1 + $0x168] sm:$0xff]  ;;  %v955_v63 = vpack.c.bf16 %v272_v57, %v271_v56  ;;  %v255_v0 = vld [vmem:[%s1465_s1 + $0x60] sm:$0xff]  ;;  %v274_v3 = vld [vmem:[%s1465_s1 + $0xf8] sm:$0xff] }
  0x14   : > { %976 = vmatprep.subr.bf16.mxu1 %v975_v36  ;;  %893 = vmatprep.mubr.f32.mxu1 %v239_v59  ;;  %v256_v1 = vld [vmem:[%s1465_s1 + $0x68] sm:$0xff]  ;;  %v987_v4 = vpack.c.bf16 %v288_v62, %v287_v61  ;;  %v289_v6 = vld [vmem:[%s1465_s1 + $0x170] sm:$0xff]  ;;  %v290_v7 = vld [vmem:[%s1465_s1 + $0x178] sm:$0xff]  ;;  %v959_v8 = vpack.c.bf16 %v274_v3, %v273_v2  ;;  %v232_v35 = vsel %vm229_vm1, %v230_v22, %v231_v25 }
  0x15   : > { %946 = vmatpush3.bf16.msra.mxu0 %v945_v37  ;;  %v957_v5 = vpack.c.bf16 %v256_v1, %v255_v0  ;;  %v257_v9 = vld [vmem:[%s1465_s1 + $0x70] sm:$0xff]  ;;  %v258_v10 = vld [vmem:[%s1465_s1 + $0x78] sm:$0xff]  ;;  %v480_v11 = vld [vmem:[%s1467_s3 + $0x80] sm:$0xff]  ;;  %v991_v13 = vpack.c.bf16 %v290_v7, %v289_v6 }
  0x16   : > { %948 = vmatprep.subr.bf16.mxu0 %v947_v40  ;;  %v481_v12 = vld [vmem:[%s1467_s3 + $0x88] sm:$0xff]  ;;  %v961_v14 = vpack.c.bf16 %v258_v10, %v257_v9  ;;  %v496_v15 = vld [vmem:[%s1467_s3 + $0x100] sm:$0xff]  ;;  %v482_v20 = vld [vmem:[%s1467_s3 + $0x90] sm:$0xff] }
  0x17   : > { %978 = vmatpush3.bf16.msra.mxu1 %v975_v36  ;;  %v497_v16 = vld [vmem:[%s1467_s3 + $0x108] sm:$0xff]  ;;  %v995_v17 = vpack.c.bf16 %v481_v12, %v480_v11  ;;  %v464_v18 = vld [vmem:[%s1467_s3] sm:$0xff]  ;;  %v483_v21 = vld [vmem:[%s1467_s3 + $0x98] sm:$0xff] }
  0x18   : > { %980 = vmatprep.subr.bf16.mxu1 %v979_v45  ;;  %v465_v19 = vld [vmem:[%s1467_s3 + $0x8] sm:$0xff]  ;;  %v1027_v23 = vpack.c.bf16 %v497_v16, %v496_v15  ;;  %vm1311_vm2 = vmneg %vm229_vm1  ;;  %v498_v27 = vld [vmem:[%s1467_s3 + $0x110] sm:$0xff]  ;;  %v999_v29 = vpack.c.bf16 %v483_v21, %v482_v20 }
  0x19   : > { %950 = vmatpush3.bf16.msra.mxu0 %v949_v47  ;;  %v997_v26 = vpack.c.bf16 %v465_v19, %v464_v18  ;;  %v499_v28 = vld [vmem:[%s1467_s3 + $0x118] sm:$0xff]  ;;  %v466_v30 = vld [vmem:[%s1467_s3 + $0x10] sm:$0xff]  ;;  %v484_v32 = vld [vmem:[%s1467_s3 + $0xa0] sm:$0xff] }
  0x1a   : > { %952 = vmatprep.subr.bf16.mxu0 %v951_v52  ;;  %v467_v31 = vld [vmem:[%s1467_s3 + $0x18] sm:$0xff]  ;;  %v485_v33 = vld [vmem:[%s1467_s3 + $0xa8] sm:$0xff]  ;;  %v1031_v34 = vpack.c.bf16 %v499_v28, %v498_v27  ;;  %v500_v37 = vld [vmem:[%s1467_s3 + $0x120] sm:$0xff] }
  0x1b   : > { %982 = vmatpush3.bf16.msra.mxu1 %v979_v45  ;;  %v1001_v36 = vpack.c.bf16 %v467_v31, %v466_v30  ;;  %v501_v38 = vld [vmem:[%s1467_s3 + $0x128] sm:$0xff]  ;;  %v1003_v39 = vpack.c.bf16 %v485_v33, %v484_v32  ;;  %v468_v40 = vld [vmem:[%s1467_s3 + $0x20] sm:$0xff]  ;;  %v486_v42 = vld [vmem:[%s1467_s3 + $0xb0] sm:$0xff] }
  0x1c   : > { %984 = vmatprep.subr.bf16.mxu1 %v983_v58  ;;  %v469_v41 = vld [vmem:[%s1467_s3 + $0x28] sm:$0xff]  ;;  %v487_v43 = vld [vmem:[%s1467_s3 + $0xb8] sm:$0xff]  ;;  %v1035_v44 = vpack.c.bf16 %v501_v38, %v500_v37  ;;  %v502_v47 = vld [vmem:[%s1467_s3 + $0x130] sm:$0xff] }
  0x1d   : > { %954 = vmatpush3.bf16.msra.mxu0 %v953_v60  ;;  %v1005_v45 = vpack.c.bf16 %v469_v41, %v468_v40  ;;  %v503_v48 = vld [vmem:[%s1467_s3 + $0x138] sm:$0xff]  ;;  %v1007_v49 = vpack.c.bf16 %v487_v43, %v486_v42  ;;  %v470_v51 = vld [vmem:[%s1467_s3 + $0x30] sm:$0xff]  ;;  %v488_v53 = vld [vmem:[%s1467_s3 + $0xc0] sm:$0xff] }
  0x1e   : > { %956 = vmatprep.subr.bf16.mxu0 %v955_v63  ;;  %v471_v52 = vld [vmem:[%s1467_s3 + $0x38] sm:$0xff]  ;;  %v489_v54 = vld [vmem:[%s1467_s3 + $0xc8] sm:$0xff]  ;;  %v490_v61 = vld [vmem:[%s1467_s3 + $0xd0] sm:$0xff] }
  0x1f   : > { %986 = vmatpush3.bf16.msra.mxu1 %v983_v58  ;;  %v1009_v56 = vpack.c.bf16 %v471_v52, %v470_v51  ;;  %v1011_v57 = vpack.c.bf16 %v489_v54, %v488_v53  ;;  %v472_v58 = vld [vmem:[%s1467_s3 + $0x40] sm:$0xff]  ;;  %v473_v59 = vld [vmem:[%s1467_s3 + $0x48] sm:$0xff]  ;;  %v491_v62 = vld [vmem:[%s1467_s3 + $0xd8] sm:$0xff] }
  0x20   : > { %988 = vmatprep.subr.bf16.mxu1 %v987_v4  ;;  %v1013_v60 = vpack.c.bf16 %v473_v59, %v472_v58  ;;  %v1015_v63 = vpack.c.bf16 %v491_v62, %v490_v61  ;;  %v474_v0 = vld [vmem:[%s1467_s3 + $0x50] sm:$0xff]  ;;  %v475_v1 = vld [vmem:[%s1467_s3 + $0x58] sm:$0xff]  ;;  %v504_v3 = vld [vmem:[%s1467_s3 + $0x140] sm:$0xff] }
  0x21   : > { %958 = vmatpush3.bf16.msra.mxu0 %v957_v5  ;;  %v1017_v2 = vpack.c.bf16 %v475_v1, %v474_v0  ;;  %v492_v6 = vld [vmem:[%s1467_s3 + $0xe0] sm:$0xff]  ;;  %v493_v7 = vld [vmem:[%s1467_s3 + $0xe8] sm:$0xff]  ;;  %v506_v12 = vld [vmem:[%s1467_s3 + $0x150] sm:$0xff] }
  0x22   : > { %960 = vmatprep.subr.bf16.mxu0 %v959_v8  ;;  %v1019_v8 = vpack.c.bf16 %v493_v7, %v492_v6  ;;  %v476_v9 = vld [vmem:[%s1467_s3 + $0x60] sm:$0xff]  ;;  %v477_v10 = vld [vmem:[%s1467_s3 + $0x68] sm:$0xff]  ;;  %v494_v15 = vld [vmem:[%s1467_s3 + $0xf0] sm:$0xff] }
  0x23   : > { %990 = vmatpush3.bf16.msra.mxu1 %v987_v4  ;;  %v505_v4 = vld [vmem:[%s1467_s3 + $0x148] sm:$0xff]  ;;  %v1021_v11 = vpack.c.bf16 %v477_v10, %v476_v9  ;;  %v495_v16 = vld [vmem:[%s1467_s3 + $0xf8] sm:$0xff]  ;;  %v478_v18 = vld [vmem:[%s1467_s3 + $0x70] sm:$0xff] }
  0x24   : > { %992 = vmatprep.subr.bf16.mxu1 %v991_v13  ;;  %v1043_v5 = vpack.c.bf16 %v505_v4, %v504_v3  ;;  %v479_v19 = vld [vmem:[%s1467_s3 + $0x78] sm:$0xff]  ;;  %v508_v21 = vld [vmem:[%s1467_s3 + $0x160] sm:$0xff]  ;;  %v510_v25 = vld [vmem:[%s1467_s3 + $0x170] sm:$0xff] }
  0x25   : > { %962 = vmatpush3.bf16.msra.mxu0 %v961_v14  ;;  %v1025_v20 = vpack.c.bf16 %v479_v19, %v478_v18  ;;  %v737_v30 = vld [vmem:[%s1466_s2] ss:$0 sm:$0xff] }
  0x26   : > { %996 = vmatprep.subr.bf16.mxu0 %v995_v17  ;;  %v1023_v17 = vpack.c.bf16 %v495_v16, %v494_v15  ;;  %v741_v24 = vld [vmem:[%s1468_s4] ss:$0 sm:$0xff] }
  0x27   : > { %994 = vmatpush3.bf16.msra.mxu1 %v991_v13  ;;  %v507_v13 = vld [vmem:[%s1467_s3 + $0x158] sm:$0xff] }
  0x28   : > { %739 = vmatmul.mubr.msk.f32.vlgmr.msra.gmra.mrb[0].mxu0 %vm1311_vm2, %v230_v22  ;;  %1028 = vmatprep.subr.bf16.mxu1 %v1027_v23  ;;  %v1047_v14 = vpack.c.bf16 %v507_v13, %v506_v12  ;;  %v509_v22 = vld [vmem:[%s1467_s3 + $0x168] sm:$0xff] }
  0x29   : > { %367 = vmatprep.mubr.f32.mxu0 %v1236_v50  ;;  %998 = vmatpush3.bf16.msra.mxu0 %v997_v26  ;;  %v511_v26 = vld [vmem:[%s1467_s3 + $0x178] sm:$0xff] }
  0x2a   : > { %894 = vmatmul.mubr.msk.f32.vlgmr.msra.gmra.mrb[0].mxu1 %vm236_vm0, %v238_v55  ;;  %1000 = vmatprep.subr.bf16.mxu0 %v999_v29  ;;  %v1039_v55 = vpack.c.bf16 %v503_v48, %v502_v47  ;;  %v1055_v27 = vpack.c.bf16 %v511_v26, %v510_v25 }
  0x2b   : > { %1030 = vmatpush3.bf16.msra.mxu1 %v1027_v23  ;;  %v1051_v23 = vpack.c.bf16 %v509_v22, %v508_v21 }
  0x2c   : > { %368 = vmatmul.mubr.f32.gmra.mrb[2].mxu0 %v232_v35  ;;  %1032 = vmatprep.subr.bf16.mxu1 %v1031_v34 }
  0x2d   : > { %1002 = vmatpush3.bf16.msra.mxu0 %v1001_v36 }
  0x2e   : > { %1004 = vmatprep.subr.bf16.mxu0 %v1003_v39 }
  0x2f   : > { %1034 = vmatpush3.bf16.msra.mxu1 %v1031_v34 }
  0x30   : > { %1036 = vmatprep.subr.bf16.mxu1 %v1035_v44 }
  0x31   : > { %1006 = vmatpush3.bf16.msra.mxu0 %v1005_v45 }
  0x32   : > { %1008 = vmatprep.subr.bf16.mxu0 %v1007_v49 }
  0x33   : > { %1038 = vmatpush3.bf16.msra.mxu1 %v1035_v44 }
  0x34   : > { %1040 = vmatprep.subr.bf16.mxu1 %v1039_v55 }
  0x35   : > { %1010 = vmatpush3.bf16.msra.mxu0 %v1009_v56 }
  0x36   : > { %1012 = vmatprep.subr.bf16.mxu0 %v1011_v57 }
  0x37   : > { %1042 = vmatpush3.bf16.msra.mxu1 %v1039_v55 }
  0x38   : > { %1044 = vmatprep.subr.bf16.mxu1 %v1043_v5 }
  0x39   : > { %1014 = vmatpush3.bf16.msra.mxu0 %v1013_v60 }
  0x3a   : > { %1016 = vmatprep.subr.bf16.mxu0 %v1015_v63 }
  0x3b   : > { %1046 = vmatpush3.bf16.msra.mxu1 %v1043_v5 }
  0x3c   : > { %1048 = vmatprep.subr.bf16.mxu1 %v1047_v14 }
  0x3d   : > { %1018 = vmatpush3.bf16.msra.mxu0 %v1017_v2 }
  0x3e   : > { %1020 = vmatprep.subr.bf16.mxu0 %v1019_v8 }
  0x3f   : > { %1050 = vmatpush3.bf16.msra.mxu1 %v1047_v14 }
  0x40   : > { %1052 = vmatprep.subr.bf16.mxu1 %v1051_v23 }
  0x41   : > { %1022 = vmatpush3.bf16.msra.mxu0 %v1021_v11 }
  0x42   : > { %1024 = vmatprep.subr.bf16.mxu0 %v1023_v17 }
  0x43   : > { %1054 = vmatpush3.bf16.msra.mxu1 %v1051_v23 }
  0x44   : > { %1056 = vmatprep.subr.bf16.mxu1 %v1055_v27 }
  0x45   : > { %1026 = vmatpush3.bf16.msra.mxu0 %v1025_v20 }
  0x47   : > { %1058 = vmatpush3.bf16.msra.mxu1 %v1055_v27 }
  0xfb   : > { %v781_v28 = vpop.f32.mrb[0].mxu0 }
  0xfc   : > { %v782_v29 = vpop.f32.mrb[1].mxu0 }
  0xfd   : > { %v783_v31 = vadd.f32 %v782_v29, %v781_v28  ;;  %v895_v32 = vpop.f32.mrb[0].mxu1 }
  0xfe   : > { %v439_v33 = vpop.f32.mrb[1].mxu1 }
  0xff   : > { %v784_v34 = vpop.f32.mrb[2].mxu0  ;;  %v365_v35 = vadd.f32 %v783_v31, %v737_v30 }
 0x100   : > { %v785_v36 = vpop.f32.mrb[3].mxu0 }
 0x101   : > { %v786_v37 = vadd.f32 %v785_v36, %v784_v34  ;;  %v440_v38 = vadd.f32 %v439_v33, %v365_v35 }
 0x103   : > { %v370_v39 = vadd.f32 %v786_v37, %v737_v30  ;;  %v448_v40 = vmax.f32 %v440_v38, 0.0 }
 0x105   : > { %v452_v41 = vrot.slane %v448_v40, 7  ;;  %583 = vmatprep.mubr.f32.mxu0 %v448_v40  ;;  %v445_v42 = vadd.f32 %v895_v32, %v370_v39  ;;  %v458_v44 = vrot.slane %v448_v40, 1 }
 0x107   : > { %743 = vmatmul.mubr.msk.f32.vlgmr.msra.gmra.mrb[4].mxu0 %vm1311_vm2, %v452_v41  ;;  %v449_v43 = vmax.f32 %v445_v42, 0.0 }
 0x109   : > { %588 = vmatprep.mubr.f32.mxu0 %v449_v43  ;;  %v453_v45 = vrot.slane %v449_v43, 7  ;;  %v459_v47 = vrot.slane %v449_v43, 1 }
 0x10b   : > { %v454_v48 = vsel %vm229_vm1, %v452_v41, %v453_v45  ;;  %v460_v49 = vsel %vm236_vm0, %v458_v44, %v459_v47 }
 0x10c   : > { %589 = vmatmul.mubr.f32.gmra.mrb[6].mxu0 %v454_v48  ;;  %928 = vmatprep.mubr.f32.mxu1 %v460_v49 }
 0x10d   : > { %929 = vmatmul.mubr.msk.f32.vlgmr.msra.gmra.mrb[2].mxu1 %vm236_vm0, %v459_v47 }
 0x1da   : > { %v837_v51 = vpop.f32.mrb[4].mxu0 }
 0x1db   : > { %v838_v52 = vpop.f32.mrb[5].mxu0 }
 0x1dc   : > { %v839_v53 = vadd.f32 %v838_v52, %v837_v51 }
 0x1de   : > { %v586_v57 = vadd.f32 %v839_v53, %v741_v24 }
 0x1df   : > { %v840_v54 = vpop.f32.mrb[6].mxu0 }
 0x1e0   : > { %v841_v55 = vpop.f32.mrb[7].mxu0  ;;  %v930_v56 = vpop.f32.mrb[2].mxu1 }
 0x1e1   : > { %v842_v58 = vadd.f32 %v841_v55, %v840_v54  ;;  %v660_v59 = vpop.f32.mrb[3].mxu1 }
 0x1e2   : > { %v661_v60 = vadd.f32 %v660_v59, %v586_v57 }
 0x1e3   : > { %v591_v61 = vadd.f32 %v842_v58, %v741_v24 }
 0x1e4   : > { %v669_v62 = vadd.f32 %v661_v60, %v1227_v46 }
 0x1e5   : > { %v666_v63 = vadd.f32 %v930_v56, %v591_v61 }
 0x1e6   : > { %671 = vst [vmem:[%s224_s22] sm:$0xff] %v669_v62 }
 0x1e7   : > { %v670_v0 = vadd.f32 %v666_v63, %v1236_v50 }
 0x1e9   : > { %672 = vst [vmem:[%s224_s22 + $0x8] sm:$0xff] %v670_v0 }
 0x1ea PF: > { %s15_s18 = sadd.s32 1, %s1073_s18  }
 0x1eb   : > { %p12_p4 = scmp.ge.s32.totalorder %s15_s18, 4  }
 0x1ed   :  { %14 = sbr.rel (!%p12_p4) target bundleno = 1 (0x1), region = 70 }

</bundles_post_ra>
